<compile_context>
chip_gen: v7x
topology: tpu7x:2x2x1
jax: 0.10.0
libtpu: 0.0.40
codegen_flags: <defaults>
</compile_context>

<pallas_src>
import functools

import jax
import jax.numpy as jnp
from jax import lax
from jax.experimental import pallas as pl
from jax.experimental.pallas import tpu as pltpu


def _dot_nt(a, b):
    """a @ b.T without materializing a transpose: contract last dims."""
    return lax.dot_general(a, b, (((1,), (1,)), ((), ())),
                           preferred_element_type=jnp.float32)


def _lg_clip_loss_kernel(weights_ref,   # SMEM (4,)     : alpha, beta, gamma, delta
                         img_ref,       # VMEM (B, TK)  bf16 flattened image chunk
                         txt_ref,       # VMEM (B, V)   bf16 pooled prompt embeddings
                         labels_ref,    # VMEM (B, NC)  f32 one-hot labels
                         w_img_ref,     # VMEM (TK, D)  bf16 image-proj chunk
                         w_txt_ref,     # VMEM (V, D)   bf16
                         w_cls_ref,     # VMEM (D, NC)  bf16
                         b_cls_ref,     # VMEM (1, NC)  f32
                         out_ref,       # VMEM (1, 128) f32 lane-dense loss slab
                         img_acc_ref):  # VMEM (B, D)   f32 scratch accumulator
    k = pl.program_id(0)
    nk = pl.num_programs(0)

    @pl.when(k == 0)
    def _init():
        img_acc_ref[...] = jnp.zeros_like(img_acc_ref)

    # ---- image encoder: tiled over F, bf16 MXU matmul, f32 accumulation ----
    img_acc_ref[...] += jnp.dot(img_ref[...], w_img_ref[...],
                                preferred_element_type=jnp.float32)

    @pl.when(k == nk - 1)
    def _finalize():
        alpha = weights_ref[0]
        beta = weights_ref[1]
        gamma = weights_ref[2]
        delta = weights_ref[3]

        img_emb = img_acc_ref[...]                         # (B, D) f32
        B = img_emb.shape[0]

        # ---- text encoder (tiny bf16 matmul, f32 result) ----
        txt_emb = jnp.dot(txt_ref[...], w_txt_ref[...],
                          preferred_element_type=jnp.float32)   # (B, D)

        # ---- L2 normalize in f32 (EUP rsqrt) ----
        img_n = img_emb * lax.rsqrt(
            jnp.sum(img_emb * img_emb, axis=-1, keepdims=True) + 1e-8)
        txt_n = txt_emb * lax.rsqrt(
            jnp.sum(txt_emb * txt_emb, axis=-1, keepdims=True) + 1e-8)

        # ---- ONE fused gram matmul for all similarity blocks ----
        z = jnp.concatenate([img_n, txt_n], axis=0)        # (2B, D) f32
        gram = _dot_nt(z, z)                               # (2B, 2B) f32
        gram_img = gram[:B, :B]                            # img . img
        cross = gram[:B, B:]                               # img . txt
        gram_txt = gram[B:, B:]                            # txt . txt

        row = lax.broadcasted_iota(jnp.int32, (B, B), 0)
        col = lax.broadcasted_iota(jnp.int32, (B, B), 1)
        eye = (row == col).astype(jnp.float32)

        def ce_mean(logits, onehot, axis):
            # mean over samples of [logsumexp(logits) - <onehot, logits>]
            m = jnp.max(logits, axis=axis, keepdims=True)
            lse = m + jnp.log(jnp.sum(jnp.exp(logits - m), axis=axis,
                                      keepdims=True))
            tgt = jnp.sum(onehot * logits, axis=axis, keepdims=True)
            return jnp.sum(lse - tgt) / jnp.float32(B)

        # ---- CLIP contrastive loss (symmetric CE over the same block) ----
        # TODO(synk): logit temperature fixed at 1/0.07 (reference model's
        # learnable temperature parameterization is unspecified).
        logit_scale = jnp.float32(1.0 / 0.07)
        sim_i2t = logit_scale * cross
        clip_loss = 0.5 * (ce_mean(sim_i2t, eye, axis=-1)      # image -> text
                           + ce_mean(sim_i2t, eye, axis=0))    # text  -> image

        # ---- classification loss ----
        cls_logits = jnp.dot(img_emb.astype(jnp.bfloat16), w_cls_ref[...],
                             preferred_element_type=jnp.float32) + b_cls_ref[...]
        cls_loss = ce_mean(cls_logits, labels_ref[...], axis=-1)

        # ---- orthogonality loss: ||G_img - I||_F^2 / B^2 (f32) ----
        orth_loss = jnp.sum((gram_img - eye) ** 2) / jnp.float32(B * B)

        # ---- graph alignment loss: MSE between similarity graphs (f32) ----
        graph_loss = jnp.mean((gram_img - gram_txt) ** 2)

        # ---- default weighting branch of LG_CLIP_LOSS.forward ----
        auxiliary = alpha * clip_loss + gamma * orth_loss + delta * graph_loss
        total = beta * cls_loss + auxiliary

        # single lane-dense output slab: one unmasked store, one writeback DMA
        lane = lax.broadcasted_iota(jnp.int32, (1, 128), 1)
        slab = jnp.zeros((1, 128), jnp.float32)
        slab = jnp.where(lane == 0, total, slab)
        slab = jnp.where(lane == 1, clip_loss, slab)
        slab = jnp.where(lane == 2, cls_loss, slab)
        slab = jnp.where(lane == 3, orth_loss, slab)
        slab = jnp.where(lane == 4, graph_loss, slab)
        out_ref[...] = slab


def _pick_tk(f, max_tk):
    """Largest multiple of 128 that divides f (f already padded to 128)."""
    tk = min(f, max(128, (max_tk // 128) * 128))
    tk = (tk // 128) * 128
    while f % tk:
        tk -= 128
    return tk


@functools.partial(jax.jit, static_argnames=("max_tk",))
def lg_clip_loss_forward(weights, img, prompts, img_labels,
                         w_img, w_txt, w_cls, b_cls, *, max_tk=2048):
    """Glue: flatten NCHW image, pool prompts, one-hot labels, call kernel."""
    B = img.shape[0]
    D = w_cls.shape[0]
    num_classes = w_cls.shape[1]

    img_flat = img.reshape(B, -1).astype(jnp.float32)
    F = img_flat.shape[1]
    F_pad = ((F + 127) // 128) * 128
    if F_pad != F:                      # zero-pad F so it tiles by 128
        img_flat = jnp.pad(img_flat, ((0, 0), (0, F_pad - F)))
        w_img = jnp.pad(w_img, ((0, F_pad - F), (0, 0)))
    tk = _pick_tk(F_pad, max_tk)
    grid = (F_pad // tk,)

    # bf16 for MXU operands; f32 everywhere else
    img_bf = img_flat.astype(jnp.bfloat16)
    w_img_bf = w_img.astype(jnp.bfloat16)
    txt_pooled = prompts.astype(jnp.float32).mean(axis=1).astype(jnp.bfloat16)
    w_txt_bf = w_txt.astype(jnp.bfloat16)
    w_cls_bf = w_cls.astype(jnp.bfloat16)
    b_cls_f = b_cls.astype(jnp.float32)
    labels_1h = jax.nn.one_hot(img_labels, num_classes, dtype=jnp.float32)
    weights_1d = weights.reshape(-1).astype(jnp.float32)

    V = txt_pooled.shape[1]
    smem = pltpu.MemorySpace.SMEM

    grid_spec = pltpu.PrefetchScalarGridSpec(
        num_scalar_prefetch=0,
        grid=grid,
        in_specs=[
            pl.BlockSpec((4,), lambda k: (0,), memory_space=smem),   # weights
            pl.BlockSpec((B, tk), lambda k: (0, k)),                 # img chunk
            pl.BlockSpec((B, V), lambda k: (0, 0)),                  # txt pooled
            pl.BlockSpec((B, num_classes), lambda k: (0, 0)),        # labels 1-hot
            pl.BlockSpec((tk, D), lambda k: (k, 0)),                 # w_img chunk
            pl.BlockSpec((V, D), lambda k: (0, 0)),                  # w_txt
            pl.BlockSpec((D, num_classes), lambda k: (0, 0)),        # w_cls
            pl.BlockSpec((1, num_classes), lambda k: (0, 0)),        # b_cls
        ],
        out_specs=pl.BlockSpec((1, 128), lambda k: (0, 0)),
        scratch_shapes=[pltpu.VMEM((B, D), jnp.float32)],
    )

    out = pl.pallas_call(
        _lg_clip_loss_kernel,
        out_shape=jax.ShapeDtypeStruct((1, 128), jnp.float32),
        grid_spec=grid_spec,
        compiler_params=pltpu.CompilerParams(
            dimension_semantics=("arbitrary",)),   # F axis is a reduction
    )(weights_1d, img_bf, txt_pooled, labels_1h,
      w_img_bf, w_txt_bf, w_cls_bf, b_cls_f)

    total = out[0, 0]
    clip_l = out[0, 1]
    cls_l = out[0, 2]
    orth_l = out[0, 3]
    graph_l = out[0, 4]
    return total, clip_l, cls_l, orth_l, graph_l


if __name__ == "__main__":
    # Small shapes consistent with the module's forward:
    B, C, H, W = 8, 4, 16, 16          # image batch, NCHW
    T, V = 8, 32                       # prompt seq len, token-embed dim
    D = 128                            # shared embedding dim
    NUM_CLASSES = 8

    key = jax.random.PRNGKey(0)
    k_img, k_prompt, k_lab, k_wi, k_wt, k_wc, k_bc = jax.random.split(key, 7)

    img = jax.random.normal(k_img, (B, C, H, W), dtype=jnp.float32)
    prompts = jax.random.normal(k_prompt, (B, T, V), dtype=jnp.float32)
    img_labels = jax.random.randint(k_lab, (B,), 0, NUM_CLASSES, dtype=jnp.int32)

    # deterministic synthetic MultiTaskModel parameters
    F_in = C * H * W
    w_img = jax.random.normal(k_wi, (F_in, D), dtype=jnp.float32) * (1.0 / F_in ** 0.5)
    w_txt = jax.random.normal(k_wt, (V, D), dtype=jnp.float32) * (1.0 / V ** 0.5)
    w_cls = jax.random.normal(k_wc, (D, NUM_CLASSES), dtype=jnp.float32) * (1.0 / D ** 0.5)
    b_cls = jax.random.normal(k_bc, (1, NUM_CLASSES), dtype=jnp.float32) * 0.01

    # LG_CLIP_LOSS.__init__ defaults: alpha = beta = gamma = delta = 1.0
    # (non-learnable, default weighting strategy, all *_param kwargs == 1)
    weights = jnp.array([1.0, 1.0, 1.0, 1.0], dtype=jnp.float32)

    # max_tk=512 -> 2-step F tiling at F=1024 (exercises pipelined accumulation)
    total, clip_l, cls_l, orth_l, graph_l = lg_clip_loss_forward(
        weights, img, prompts, img_labels, w_img, w_txt, w_cls, b_cls,
        max_tk=512)
    jax.block_until_ready(total)

    print(f"alpha = 1.0 and the clip loss is {clip_l}")
    print(f"delta = 1.0 and the graph_align loss is {graph_l}")
    print(f"beta = 1.0 and the classification loss is {cls_l}")
    print(f"gamma = 1.0 and the othogonal loss is {orth_l}")
    print(f"the total loss is {total}\n")
    print("KERNEL_OK")
</pallas_src>

<mosaic_0001>
module attributes {stable_mosaic.version = 11 : i64} {
  func.func @_lg_clip_loss_kernel(%arg0: i32, %arg1: memref<4xf32, #tpu.memory_space<smem>>, %arg2: memref<8x512xbf16, #tpu.memory_space<vmem>>, %arg3: memref<8x32xbf16, #tpu.memory_space<vmem>>, %arg4: memref<8x8xf32, #tpu.memory_space<vmem>>, %arg5: memref<512x128xbf16, #tpu.memory_space<vmem>>, %arg6: memref<32x128xbf16, #tpu.memory_space<vmem>>, %arg7: memref<128x8xbf16, #tpu.memory_space<vmem>>, %arg8: memref<1x8xf32, #tpu.memory_space<vmem>>, %arg9: memref<1x128xf32, #tpu.memory_space<vmem>>, %arg10: memref<8x128xf32, #tpu.memory_space<vmem>>) attributes {dimension_semantics = [#tpu.dimension_semantics<arbitrary>], iteration_bounds = array<i64: 2>, scalar_prefetch = 0 : i64, scratch_operands = 1 : i64, tpu.core_type = #tpu.core_type<tc>, window_params = [{transform_indices = @transform_0, window_bounds = array<i64: 4>}, {transform_indices = @transform_1, window_bounds = array<i64: 8, 512>}, {pipeline_mode = #tpu.pipeline_mode<synchronous>, transform_indices = @transform_2, window_bounds = array<i64: 8, 32>}, {pipeline_mode = #tpu.pipeline_mode<synchronous>, transform_indices = @transform_3, window_bounds = array<i64: 8, 8>}, {transform_indices = @transform_4, window_bounds = array<i64: 512, 128>}, {pipeline_mode = #tpu.pipeline_mode<synchronous>, transform_indices = @transform_5, window_bounds = array<i64: 32, 128>}, {pipeline_mode = #tpu.pipeline_mode<synchronous>, transform_indices = @transform_6, window_bounds = array<i64: 128, 8>}, {pipeline_mode = #tpu.pipeline_mode<synchronous>, transform_indices = @transform_7, window_bounds = array<i64: 1, 8>}, {pipeline_mode = #tpu.pipeline_mode<synchronous>, transform_indices = @transform_8, window_bounds = array<i64: 1, 128>}]} {
    %c0_i32 = arith.constant 0 : i32
    %0 = arith.cmpi eq, %arg0, %c0_i32 : i32
    %1 = arith.extui %0 : i1 to i32
    %c0_i32_0 = arith.constant 0 : i32
    %2 = arith.cmpi ne, %1, %c0_i32_0 : i32
    scf.if %2 {
      %cst_9 = arith.constant 0.000000e+00 : f32
      %12 = vector.broadcast %cst_9 : f32 to vector<8x128xf32>
      %c0_10 = arith.constant 0 : index
      %c0_11 = arith.constant 0 : index
      %13 = vector.load %arg10[%c0_10, %c0_11] : memref<8x128xf32, #tpu.memory_space<vmem>>, vector<8x128xf32>
      tpu.vector_store %arg10[%c0_10, %c0_11], %12 {strides = array<i32>} : memref<8x128xf32, #tpu.memory_space<vmem>>, vector<8x128xf32>,
    } else {
    }
    %c0 = arith.constant 0 : index
    %c0_1 = arith.constant 0 : index
    %3 = vector.load %arg10[%c0, %c0_1] : memref<8x128xf32, #tpu.memory_space<vmem>>, vector<8x128xf32>
    %c0_2 = arith.constant 0 : index
    %c0_3 = arith.constant 0 : index
    %4 = vector.load %arg2[%c0_2, %c0_3] : memref<8x512xbf16, #tpu.memory_space<vmem>>, vector<8x512xbf16>
    %c0_4 = arith.constant 0 : index
    %c0_5 = arith.constant 0 : index
    %5 = vector.load %arg5[%c0_4, %c0_5] : memref<512x128xbf16, #tpu.memory_space<vmem>>, vector<512x128xbf16>
    %cst = arith.constant dense<0.000000e+00> : vector<8x128xf32>
    %6 = tpu.matmul %4, %5, %cst {dimension_numbers = #tpu.dot_dimension_numbers<[1], [0], [0], [1], [0, 0, 1, 1], [], []>} : vector<8x512xbf16>, vector<512x128xbf16>, vector<8x128xf32> -> vector<8x128xf32>
    %7 = arith.addf %3, %6 : vector<8x128xf32>
    %c0_6 = arith.constant 0 : index
    %c0_7 = arith.constant 0 : index
    %8 = vector.load %arg10[%c0_6, %c0_7] : memref<8x128xf32, #tpu.memory_space<vmem>>, vector<8x128xf32>
    tpu.vector_store %arg10[%c0_6, %c0_7], %7 {strides = array<i32>} : memref<8x128xf32, #tpu.memory_space<vmem>>, vector<8x128xf32>,
    %c1_i32 = arith.constant 1 : i32
    %9 = arith.cmpi eq, %arg0, %c1_i32 : i32
    %10 = arith.extui %9 : i1 to i32
    %c0_i32_8 = arith.constant 0 : i32
    %11 = arith.cmpi ne, %10, %c0_i32_8 : i32
    scf.if %11 {
      %c0_9 = arith.constant 0 : index
      %12 = memref.load %arg1[%c0_9] : memref<4xf32, #tpu.memory_space<smem>>
      %c1 = arith.constant 1 : index
      %13 = memref.load %arg1[%c1] : memref<4xf32, #tpu.memory_space<smem>>
      %c2 = arith.constant 2 : index
      %14 = memref.load %arg1[%c2] : memref<4xf32, #tpu.memory_space<smem>>
      %c3 = arith.constant 3 : index
      %15 = memref.load %arg1[%c3] : memref<4xf32, #tpu.memory_space<smem>>
      %c0_10 = arith.constant 0 : index
      %c0_11 = arith.constant 0 : index
      %16 = vector.load %arg10[%c0_10, %c0_11] : memref<8x128xf32, #tpu.memory_space<vmem>>, vector<8x128xf32>
      %c0_12 = arith.constant 0 : index
      %c0_13 = arith.constant 0 : index
      %17 = vector.load %arg3[%c0_12, %c0_13] : memref<8x32xbf16, #tpu.memory_space<vmem>>, vector<8x32xbf16>
      %c0_14 = arith.constant 0 : index
      %c0_15 = arith.constant 0 : index
      %18 = vector.load %arg6[%c0_14, %c0_15] : memref<32x128xbf16, #tpu.memory_space<vmem>>, vector<32x128xbf16>
      %cst_16 = arith.constant dense<0.000000e+00> : vector<8x128xf32>
      %19 = tpu.matmul %17, %18, %cst_16 {dimension_numbers = #tpu.dot_dimension_numbers<[1], [0], [0], [1], [0, 0, 1, 1], [], []>} : vector<8x32xbf16>, vector<32x128xbf16>, vector<8x128xf32> -> vector<8x128xf32>
      %20 = arith.mulf %16, %16 : vector<8x128xf32>
      %cst_17 = arith.constant dense<0.000000e+00> : vector<8xf32>
      %21 = vector.multi_reduction <add>, %20, %cst_17 [1] : vector<8x128xf32> to vector<8xf32>
      %22 = vector.shape_cast %21 : vector<8xf32> to vector<8x1xf32>
      %cst_18 = arith.constant 9.99999993E-9 : f32
      %23 = vector.broadcast %cst_18 : f32 to vector<8x1xf32>
      %24 = arith.addf %22, %23 : vector<8x1xf32>
      %25 = math.rsqrt %24 : vector<8x1xf32>
      %26 = vector.broadcast %25 : vector<8x1xf32> to vector<8x128xf32>
      %27 = arith.mulf %16, %26 : vector<8x128xf32>
      %28 = arith.mulf %19, %19 : vector<8x128xf32>
      %cst_19 = arith.constant dense<0.000000e+00> : vector<8xf32>
      %29 = vector.multi_reduction <add>, %28, %cst_19 [1] : vector<8x128xf32> to vector<8xf32>
      %30 = vector.shape_cast %29 : vector<8xf32> to vector<8x1xf32>
      %cst_20 = arith.constant 9.99999993E-9 : f32
      %31 = vector.broadcast %cst_20 : f32 to vector<8x1xf32>
      %32 = arith.addf %30, %31 : vector<8x1xf32>
      %33 = math.rsqrt %32 : vector<8x1xf32>
      %34 = vector.broadcast %33 : vector<8x1xf32> to vector<8x128xf32>
      %35 = arith.mulf %19, %34 : vector<8x128xf32>
      %36 = tpu.concatenate %27, %35 in 0 : vector<8x128xf32>, vector<8x128xf32> -> vector<16x128xf32>
      %cst_21 = arith.constant dense<0.000000e+00> : vector<16x16xf32>
      %37 = tpu.matmul %36, %36, %cst_21 {dimension_numbers = #tpu.dot_dimension_numbers<[1], [1], [0], [0], [0, 0, 1, 0], [], []>} : vector<16x128xf32>, vector<16x128xf32>, vector<16x16xf32> -> vector<16x16xf32>
      %38 = vector.extract_strided_slice %37 {offsets = [0, 0], sizes = [8, 8], strides = [1, 1]} : vector<16x16xf32> to vector<8x8xf32>
      %39 = vector.extract_strided_slice %37 {offsets = [0, 8], sizes = [8, 8], strides = [1, 1]} : vector<16x16xf32> to vector<8x8xf32>
      %40 = vector.extract_strided_slice %37 {offsets = [8, 8], sizes = [8, 8], strides = [1, 1]} : vector<16x16xf32> to vector<8x8xf32>
      %41 = tpu.iota {dimensions = array<i32: 0>} : vector<8x8xi32>
      %42 = tpu.iota {dimensions = array<i32: 1>} : vector<8x8xi32>
      %43 = arith.cmpi eq, %41, %42 : vector<8x8xi32>
      %44 = arith.extui %43 : vector<8x8xi1> to vector<8x8xi32>
      %45 = arith.sitofp %44 : vector<8x8xi32> to vector<8x8xf32>
      %cst_22 = arith.constant 14.2857141 : f32
      %46 = vector.broadcast %cst_22 : f32 to vector<8x8xf32>
      %47 = arith.mulf %46, %39 : vector<8x8xf32>
      %cst_23 = arith.constant dense<0xFF800000> : vector<8xf32>
      %48 = vector.multi_reduction <maximumf>, %47, %cst_23 [1] : vector<8x8xf32> to vector<8xf32>
      %49 = vector.shape_cast %48 : vector<8xf32> to vector<8x1xf32>
      %50 = vector.broadcast %49 : vector<8x1xf32> to vector<8x8xf32>
      %51 = arith.subf %47, %50 : vector<8x8xf32>
      %52 = math.exp %51 : vector<8x8xf32>
      %cst_24 = arith.constant dense<0.000000e+00> : vector<8xf32>
      %53 = vector.multi_reduction <add>, %52, %cst_24 [1] : vector<8x8xf32> to vector<8xf32>
      %54 = vector.shape_cast %53 : vector<8xf32> to vector<8x1xf32>
      %55 = math.log %54 : vector<8x1xf32>
      %56 = arith.addf %49, %55 : vector<8x1xf32>
      %57 = arith.mulf %45, %47 : vector<8x8xf32>
      %cst_25 = arith.constant dense<0.000000e+00> : vector<8xf32>
      %58 = vector.multi_reduction <add>, %57, %cst_25 [1] : vector<8x8xf32> to vector<8xf32>
      %59 = vector.shape_cast %58 : vector<8xf32> to vector<8x1xf32>
      %60 = arith.subf %56, %59 : vector<8x1xf32>
      %61 = vector.shape_cast %60 : vector<8x1xf32> to vector<1x8x1xf32>
      %cst_26 = arith.constant dense<0.000000e+00> : vector<1xf32>
      %62 = vector.multi_reduction <add>, %61, %cst_26 [1, 2] : vector<1x8x1xf32> to vector<1xf32>
      %63 = vector.shape_cast %62 : vector<1xf32> to vector<1x1x1xf32>
      %64 = vector.extract %63[0, 0, 0] : f32 from vector<1x1x1xf32>
      %cst_27 = arith.constant 8.000000e+00 : f32
      %65 = arith.divf %64, %cst_27 : f32
      %cst_28 = arith.constant dense<0xFF800000> : vector<8xf32>
      %66 = vector.multi_reduction <maximumf>, %47, %cst_28 [0] : vector<8x8xf32> to vector<8xf32>
      %67 = vector.shape_cast %66 : vector<8xf32> to vector<1x8xf32>
      %68 = vector.broadcast %67 : vector<1x8xf32> to vector<8x8xf32>
      %69 = arith.subf %47, %68 : vector<8x8xf32>
      %70 = math.exp %69 : vector<8x8xf32>
      %cst_29 = arith.constant dense<0.000000e+00> : vector<8xf32>
      %71 = vector.multi_reduction <add>, %70, %cst_29 [0] : vector<8x8xf32> to vector<8xf32>
      %72 = vector.shape_cast %71 : vector<8xf32> to vector<1x8xf32>
      %73 = math.log %72 : vector<1x8xf32>
      %74 = arith.addf %67, %73 : vector<1x8xf32>
      %75 = arith.mulf %45, %47 : vector<8x8xf32>
      %cst_30 = arith.constant dense<0.000000e+00> : vector<8xf32>
      %76 = vector.multi_reduction <add>, %75, %cst_30 [0] : vector<8x8xf32> to vector<8xf32>
      %77 = vector.shape_cast %76 : vector<8xf32> to vector<1x8xf32>
      %78 = arith.subf %74, %77 : vector<1x8xf32>
      %79 = vector.shape_cast %78 : vector<1x8xf32> to vector<1x1x8xf32>
      %cst_31 = arith.constant dense<0.000000e+00> : vector<1xf32>
      %80 = vector.multi_reduction <add>, %79, %cst_31 [1, 2] : vector<1x1x8xf32> to vector<1xf32>
      %81 = vector.shape_cast %80 : vector<1xf32> to vector<1x1x1xf32>
      %82 = vector.extract %81[0, 0, 0] : f32 from vector<1x1x1xf32>
      %cst_32 = arith.constant 8.000000e+00 : f32
      %83 = arith.divf %82, %cst_32 : f32
      %84 = arith.addf %65, %83 : f32
      %cst_33 = arith.constant 5.000000e-01 : f32
      %85 = arith.mulf %cst_33, %84 : f32
      %86 = arith.truncf %16 : vector<8x128xf32> to vector<8x128xbf16>
      %c0_34 = arith.constant 0 : index
      %c0_35 = arith.constant 0 : index
      %87 = vector.load %arg7[%c0_34, %c0_35] : memref<128x8xbf16, #tpu.memory_space<vmem>>, vector<128x8xbf16>
      %cst_36 = arith.constant dense<0.000000e+00> : vector<8x8xf32>
      %88 = tpu.matmul %86, %87, %cst_36 {dimension_numbers = #tpu.dot_dimension_numbers<[1], [0], [0], [1], [0, 0, 1, 1], [], []>} : vector<8x128xbf16>, vector<128x8xbf16>, vector<8x8xf32> -> vector<8x8xf32>
      %c0_37 = arith.constant 0 : index
      %c0_38 = arith.constant 0 : index
      %89 = vector.load %arg8[%c0_37, %c0_38] : memref<1x8xf32, #tpu.memory_space<vmem>>, vector<1x8xf32>
      %90 = vector.broadcast %89 : vector<1x8xf32> to vector<8x8xf32>
      %91 = arith.addf %88, %90 : vector<8x8xf32>
      %c0_39 = arith.constant 0 : index
      %c0_40 = arith.constant 0 : index
      %92 = vector.load %arg4[%c0_39, %c0_40] : memref<8x8xf32, #tpu.memory_space<vmem>>, vector<8x8xf32>
      %cst_41 = arith.constant dense<0xFF800000> : vector<8xf32>
      %93 = vector.multi_reduction <maximumf>, %91, %cst_41 [1] : vector<8x8xf32> to vector<8xf32>
      %94 = vector.shape_cast %93 : vector<8xf32> to vector<8x1xf32>
      %95 = vector.broadcast %94 : vector<8x1xf32> to vector<8x8xf32>
      %96 = arith.subf %91, %95 : vector<8x8xf32>
      %97 = math.exp %96 : vector<8x8xf32>
      %cst_42 = arith.constant dense<0.000000e+00> : vector<8xf32>
      %98 = vector.multi_reduction <add>, %97, %cst_42 [1] : vector<8x8xf32> to vector<8xf32>
      %99 = vector.shape_cast %98 : vector<8xf32> to vector<8x1xf32>
      %100 = math.log %99 : vector<8x1xf32>
      %101 = arith.addf %94, %100 : vector<8x1xf32>
      %102 = arith.mulf %92, %91 : vector<8x8xf32>
      %cst_43 = arith.constant dense<0.000000e+00> : vector<8xf32>
      %103 = vector.multi_reduction <add>, %102, %cst_43 [1] : vector<8x8xf32> to vector<8xf32>
      %104 = vector.shape_cast %103 : vector<8xf32> to vector<8x1xf32>
      %105 = arith.subf %101, %104 : vector<8x1xf32>
      %106 = vector.shape_cast %105 : vector<8x1xf32> to vector<1x8x1xf32>
      %cst_44 = arith.constant dense<0.000000e+00> : vector<1xf32>
      %107 = vector.multi_reduction <add>, %106, %cst_44 [1, 2] : vector<1x8x1xf32> to vector<1xf32>
      %108 = vector.shape_cast %107 : vector<1xf32> to vector<1x1x1xf32>
      %109 = vector.extract %108[0, 0, 0] : f32 from vector<1x1x1xf32>
      %cst_45 = arith.constant 8.000000e+00 : f32
      %110 = arith.divf %109, %cst_45 : f32
      %111 = arith.subf %38, %45 : vector<8x8xf32>
      %112 = arith.mulf %111, %111 : vector<8x8xf32>
      %113 = vector.shape_cast %112 : vector<8x8xf32> to vector<1x8x8xf32>
      %cst_46 = arith.constant dense<0.000000e+00> : vector<1xf32>
      %114 = vector.multi_reduction <add>, %113, %cst_46 [1, 2] : vector<1x8x8xf32> to vector<1xf32>
      %115 = vector.shape_cast %114 : vector<1xf32> to vector<1x1x1xf32>
      %116 = vector.extract %115[0, 0, 0] : f32 from vector<1x1x1xf32>
      %cst_47 = arith.constant 6.400000e+01 : f32
      %117 = arith.divf %116, %cst_47 : f32
      %118 = arith.subf %38, %40 : vector<8x8xf32>
      %119 = arith.mulf %118, %118 : vector<8x8xf32>
      %120 = vector.shape_cast %119 : vector<8x8xf32> to vector<1x8x8xf32>
      %cst_48 = arith.constant dense<0.000000e+00> : vector<1xf32>
      %121 = vector.multi_reduction <add>, %120, %cst_48 [1, 2] : vector<1x8x8xf32> to vector<1xf32>
      %122 = vector.shape_cast %121 : vector<1xf32> to vector<1x1x1xf32>
      %123 = vector.extract %122[0, 0, 0] : f32 from vector<1x1x1xf32>
      %cst_49 = arith.constant 6.400000e+01 : f32
      %124 = arith.divf %123, %cst_49 : f32
      %125 = arith.mulf %12, %85 : f32
      %126 = arith.mulf %14, %117 : f32
      %127 = arith.addf %125, %126 : f32
      %128 = arith.mulf %15, %124 : f32
      %129 = arith.addf %127, %128 : f32
      %130 = arith.mulf %13, %110 : f32
      %131 = arith.addf %130, %129 : f32
      %132 = tpu.iota {dimensions = array<i32: 1>} : vector<1x128xi32>
      %cst_50 = arith.constant 0.000000e+00 : f32
      %133 = vector.broadcast %cst_50 : f32 to vector<1x128xf32>
      %c0_i32_51 = arith.constant 0 : i32
      %134 = vector.broadcast %c0_i32_51 : i32 to vector<1x128xi32>
      %135 = arith.cmpi eq, %132, %134 : vector<1x128xi32>
      %136 = vector.broadcast %131 : f32 to vector<1x128xf32>
      %137 = arith.select %135, %136, %133 : vector<1x128xi1>, vector<1x128xf32>
      %c1_i32_52 = arith.constant 1 : i32
      %138 = vector.broadcast %c1_i32_52 : i32 to vector<1x128xi32>
      %139 = arith.cmpi eq, %132, %138 : vector<1x128xi32>
      %140 = vector.broadcast %85 : f32 to vector<1x128xf32>
      %141 = arith.select %139, %140, %137 : vector<1x128xi1>, vector<1x128xf32>
      %c2_i32 = arith.constant 2 : i32
      %142 = vector.broadcast %c2_i32 : i32 to vector<1x128xi32>
      %143 = arith.cmpi eq, %132, %142 : vector<1x128xi32>
      %144 = vector.broadcast %110 : f32 to vector<1x128xf32>
      %145 = arith.select %143, %144, %141 : vector<1x128xi1>, vector<1x128xf32>
      %c3_i32 = arith.constant 3 : i32
      %146 = vector.broadcast %c3_i32 : i32 to vector<1x128xi32>
      %147 = arith.cmpi eq, %132, %146 : vector<1x128xi32>
      %148 = vector.broadcast %117 : f32 to vector<1x128xf32>
      %149 = arith.select %147, %148, %145 : vector<1x128xi1>, vector<1x128xf32>
      %c4_i32 = arith.constant 4 : i32
      %150 = vector.broadcast %c4_i32 : i32 to vector<1x128xi32>
      %151 = arith.cmpi eq, %132, %150 : vector<1x128xi32>
      %152 = vector.broadcast %124 : f32 to vector<1x128xf32>
      %153 = arith.select %151, %152, %149 : vector<1x128xi1>, vector<1x128xf32>
      %c0_53 = arith.constant 0 : index
      %c0_54 = arith.constant 0 : index
      %154 = vector.load %arg9[%c0_53, %c0_54] : memref<1x128xf32, #tpu.memory_space<vmem>>, vector<1x128xf32>
      tpu.vector_store %arg9[%c0_53, %c0_54], %153 {strides = array<i32>} : memref<1x128xf32, #tpu.memory_space<vmem>>, vector<1x128xf32>,
    } else {
    }
    return
  }
  func.func @transform_0(%arg0: i32) -> i32 {
    %c0_i32 = arith.constant 0 : i32
    %c0_i32_0 = arith.constant 0 : i32
    return %c0_i32 : i32
  }
  func.func @transform_1(%arg0: i32) -> (i32, i32) {
    %c0_i32 = arith.constant 0 : i32
    %c0_i32_0 = arith.constant 0 : i32
    return %c0_i32, %arg0 : i32, i32
  }
  func.func @transform_2(%arg0: i32) -> (i32, i32) {
    %c0_i32 = arith.constant 0 : i32
    %c0_i32_0 = arith.constant 0 : i32
    %c0_i32_1 = arith.constant 0 : i32
    return %c0_i32, %c0_i32_0 : i32, i32
  }
  func.func @transform_3(%arg0: i32) -> (i32, i32) {
    %c0_i32 = arith.constant 0 : i32
    %c0_i32_0 = arith.constant 0 : i32
    %c0_i32_1 = arith.constant 0 : i32
    return %c0_i32, %c0_i32_0 : i32, i32
  }
  func.func @transform_4(%arg0: i32) -> (i32, i32) {
    %c0_i32 = arith.constant 0 : i32
    %c0_i32_0 = arith.constant 0 : i32
    return %arg0, %c0_i32 : i32, i32
  }
  func.func @transform_5(%arg0: i32) -> (i32, i32) {
    %c0_i32 = arith.constant 0 : i32
    %c0_i32_0 = arith.constant 0 : i32
    %c0_i32_1 = arith.constant 0 : i32
    return %c0_i32, %c0_i32_0 : i32, i32
  }
  func.func @transform_6(%arg0: i32) -> (i32, i32) {
    %c0_i32 = arith.constant 0 : i32
    %c0_i32_0 = arith.constant 0 : i32
    %c0_i32_1 = arith.constant 0 : i32
    return %c0_i32, %c0_i32_0 : i32, i32
  }
  func.func @transform_7(%arg0: i32) -> (i32, i32) {
    %c0_i32 = arith.constant 0 : i32
    %c0_i32_0 = arith.constant 0 : i32
    %c0_i32_1 = arith.constant 0 : i32
    return %c0_i32, %c0_i32_0 : i32, i32
  }
  func.func @transform_8(%arg0: i32) -> (i32, i32) {
    %c0_i32 = arith.constant 0 : i32
    %c0_i32_0 = arith.constant 0 : i32
    %c0_i32_1 = arith.constant 0 : i32
    return %c0_i32, %c0_i32_0 : i32, i32
  }
}

</mosaic_0001>

<bundles_post_ra>
// kernel: lg_clip_loss_forward.1
= control target key start
LH: loop header
LB: loop body
LE: loop exit
PB: predicated region body
PF: predicated region fallthrough
CT: control target
= control target key end

     0   :  { %s1704_s0 = inlined_call_operand.vmem [shape: f32[4], index: 0, kind: input, shape index: {}]   ;;  %s1705_s1 = inlined_call_operand.vmem [shape: bf16[8,1024], index: 1, kind: input, shape index: {}]   ;;  %s1706_s2 = inlined_call_operand.vmem [shape: bf16[8,32], index: 2, kind: input, shape index: {}]   ;;  %s1707_s3 = inlined_call_operand.vmem [shape: f32[8,8], index: 3, kind: input, shape index: {}]   ;;  %s1708_s4 = inlined_call_operand.vmem [shape: bf16[1024,128], index: 4, kind: input, shape index: {}]   ;;  %s1709_s5 = inlined_call_operand.vmem [shape: bf16[32,128], index: 5, kind: input, shape index: {}]   ;;  %s1710_s6 = inlined_call_operand.vmem [shape: bf16[128,8], index: 6, kind: input, shape index: {}]   ;;  %s1711_s7 = inlined_call_operand.vmem [shape: f32[1,8], index: 7, kind: input, shape index: {}]   ;;  %s1712_s8 = inlined_call_operand.vmem [shape: f32[1,128], index: 8, kind: output, shape index: {}]  }
   0x1   :  { %1713 = sst [smem:[#allocation6_spill]] %s1704_s0 }
   0x2   :  { %13 = vsyncpa [#allocation4], 0  ;;  %s1537_s27 = smov 0  }
   0x3 LB: > { %s1543_s28 = sadd.s32 4294967295, %s1484_s27   ;;  %p1199_p0 = scmp.ge.s32.totalorder %s1484_s27, 1  ;;  %s1484_s27 = sphi %s1537_s27, %s19_s27  }
   0x4   : > { %p223_p1 = scmp.lt.s32.totalorder %s1484_s27, 3  ;;  %s1714_s0 = sld [smem:[#allocation6_spill]] }
   0x5   : > { %p1381_p4 = scmp.eq.s32.totalorder %s1543_s28, 0 }
   0x6   : > { %p1551_p3 = pnand %p1199_p0, %p223_p1 }
   0x8   : > { %p1377_p5 = pneg %p1551_p3 }
   0xa   : > { %s236_s9 = sshll.u32 %s1714_s0, 4  ;;  %p1378_p6 = pnand %p1381_p4, %p1377_p5  ;;  %s237_s9 = int_to_ptr.vmem [resolvable:$true] %s236_s9 }
   0xb   : > { %s1459_s11 = scalar_lea.vmem %s237_s9, 16  ;;  %p1467_p11 = scmp.lt.s32.totalorder %s237_s9, %s237_s9 }
   0xc   : > { %p1460_p7 = scmp.ne.s32.totalorder %s237_s9, %s1459_s11  ;;  %p1461_p8 = pneg %p1378_p6 }
   0xd   : > { %p1468_p12 = scmp.lt.s32.totalorder %s1459_s11, %s1459_s11 }
   0xe   : > { %p1462_p9 = pnand %p1461_p8, %p1460_p7 }
   0xf   : > { %p1469_p13 = por %p1468_p12, %p1467_p11 }
  0x10   : > { %p1463_p10 = pneg %p1462_p9 }
  0x12   : > { %p1470_p2 = pnand %p1469_p13, %p1463_p10 }
  0x14   : > { %1473 = shalt.err (!%p1470_p2)
}
  0x15   : > { %s1486_s12 = smov [#allocation3]   ;;  %282 = sbr.rel (%p1551_p3) target bundleno = 1551 (0x60f), region = 52 }
  0x16   : > { %1380 = dma.vmem_to_smem (!%p1378_p6), %s237_s9, 16, %s1486_s12, [#allocation4]  }
  0x1c   : > { %1479 = dma.done.wait (%p1381_p4), [#allocation4], 16  }
  0x1d   : > { %1481 = vsyncadd (%p1381_p4), [#allocation4], 4294967280 }
  0x1e   : > { %288 = sfence }
  0x1f   : > { %s1204_s13 = sshll.u32 %s1543_s28, 2  ;;  %s1206_s14 = sshll.u32 %s1543_s28, 6 }
  0x20   : > { %p318_p0 = scmp.lt.s32.totalorder %s1204_s13, 7  ;;  %p324_p1 = scmp.lt.s32.totalorder %s1206_s14, 127 }
  0x21   : > { %p1716_p2 = scmp.ne.s32.totalorder %s1543_s28, 0 }
  0x22   : > { %s1718_s13 = smov (!%p318_p0, %s1204_s13), 7  ;;  %s1720_s14 = smov (!%p324_p1, %s1206_s14), 127 }
  0x23   : > { %s1205_s15 = sshll.u32 %s1718_s13, 2  ;;  %s1207_s19 = sshll.u32 %s1720_s14, 2  ;;  %v1487_v0 = vmov (!%p1716_p2), 0.0  }
  0x24   : > { %s1571_s18 = scalar_lea.vmem %s1705_s1, %s1205_s15  ;;  %s1576_s22 = scalar_lea.vmem %s1708_s4, %s1207_s19  ;;  %334 = vst [vmem:[#allocation2] sm:$0xff] (!%p1716_p2), %v1487_v0 }
  0x25   : > { %333 = sbr.rel (%p1716_p2) target bundleno = 44 (0x2c), region = 60 }
  0x2c PF: > { %v1397_v1 = vld [vmem:[%s1576_s22 + $0x40] sm:$0xff]   ;;  %v1401_v5 = vld [vmem:[%s1576_s22 + $0x48] sm:$0xff]   ;;  %v1405_v9 = vld [vmem:[%s1576_s22 + $0x50] sm:$0xff]   ;;  %p1245_p3 = scmp.ne.s32.totalorder %s1543_s28, 1 }
  0x2d   : > { %v1398_v2 = vld [vmem:[%s1576_s22 + $0xc0] sm:$0xff]   ;;  %1264 = vmatprep.subr.bf16.mxu0 %v1397_v1  ;;  %v1402_v6 = vld [vmem:[%s1576_s22 + $0xc8] sm:$0xff]   ;;  %v1406_v10 = vld [vmem:[%s1576_s22 + $0xd0] sm:$0xff]   ;;  %v1488_v53 = vmov (!%p1245_p3), 0.0   ;;  %vm1489_vm0 = vmmov (!%p1245_p3), 0   ;;  %vm716_vm1 = vcmask (!%p1245_p3), 261120  }
  0x2e   : > { %v1399_v3 = vld [vmem:[%s1576_s22] sm:$0xff]   ;;  %1286 = vmatprep.subr.bf16.mxu1 %v1398_v2  ;;  %v1403_v7 = vld [vmem:[%s1576_s22 + $0x8] sm:$0xff]   ;;  %v1407_v11 = vld [vmem:[%s1576_s22 + $0x10] sm:$0xff]   ;;  %vm866_vm2 = vcmask (!%p1245_p3), 64512   ;;  %vm855_vm3 = vcmask (!%p1245_p3), 130112   ;;  %s1490_s26 = smov (!%p1245_p3), 120  }
  0x2f   : > { %v1400_v4 = vld [vmem:[%s1576_s22 + $0x80] sm:$0xff]   ;;  %1265 = vmatpush3.bf16.msra.mxu0 %v1399_v3  ;;  %v1404_v8 = vld [vmem:[%s1576_s22 + $0x88] sm:$0xff]   ;;  %v1408_v12 = vld [vmem:[%s1576_s22 + $0x90] sm:$0xff]   ;;  %s1491_s28 = smov (!%p1245_p3), 8   ;;  %vm930_vm5 = vcmask (!%p1245_p3), 57344   ;;  %vm882_vm6 = vcmask (!%p1245_p3), 7168  }
  0x30   : > { %1287 = vmatpush3.bf16.msra.mxu1 %v1400_v4  ;;  %1266 = vmatprep.subr.bf16.mxu0 %v1401_v5  ;;  %v1409_v13 = vld [vmem:[%s1576_s22 + $0x58] sm:$0xff]   ;;  %v1413_v17 = vld [vmem:[%s1576_s22 + $0x60] sm:$0xff]   ;;  %v1417_v21 = vld [vmem:[%s1576_s22 + $0x68] sm:$0xff]   ;;  %s694_s10 = sld [smem:[#allocation3]] (!%p1245_p3)  ;;  %s1247_s14 = sld [smem:[#allocation3 + $0x2]] (!%p1245_p3) }
  0x31   : > { %1288 = vmatprep.subr.bf16.mxu1 %v1402_v6  ;;  %v1410_v14 = vld [vmem:[%s1576_s22 + $0xd8] sm:$0xff]   ;;  %v1414_v18 = vld [vmem:[%s1576_s22 + $0xe0] sm:$0xff]   ;;  %v1418_v22 = vld [vmem:[%s1576_s22 + $0xe8] sm:$0xff]   ;;  %s1248_s15 = sld [smem:[#allocation3 + $0x3]] (!%p1245_p3)  ;;  %s1246_s20 = sld [smem:[#allocation3 + $0x1]] (!%p1245_p3) }
  0x32   : > { %v1411_v15 = vld [vmem:[%s1576_s22 + $0x18] sm:$0xff]   ;;  %v1415_v19 = vld [vmem:[%s1576_s22 + $0x20] sm:$0xff]   ;;  %v1419_v23 = vld [vmem:[%s1576_s22 + $0x28] sm:$0xff]  }
  0x33   : > { %1267 = vmatpush3.bf16.msra.mxu0 %v1403_v7  ;;  %v1412_v16 = vld [vmem:[%s1576_s22 + $0x98] sm:$0xff]   ;;  %v1416_v20 = vld [vmem:[%s1576_s22 + $0xa0] sm:$0xff]   ;;  %v1420_v24 = vld [vmem:[%s1576_s22 + $0xa8] sm:$0xff]  }
  0x34   : > { %1289 = vmatpush3.bf16.msra.mxu1 %v1404_v8  ;;  %1268 = vmatprep.subr.bf16.mxu0 %v1405_v9  ;;  %v1421_v25 = vld [vmem:[%s1576_s22 + $0x70] sm:$0xff]   ;;  %v1425_v29 = vld [vmem:[%s1576_s22 + $0x78] sm:$0xff]   ;;  %v336_v33 = vld [vmem:[%s1571_s18] sm:$0xff] }
  0x35   : > { %1290 = vmatprep.subr.bf16.mxu1 %v1406_v10  ;;  %v1422_v26 = vld [vmem:[%s1576_s22 + $0xf0] sm:$0xff]   ;;  %v1426_v30 = vld [vmem:[%s1576_s22 + $0xf8] sm:$0xff]   ;;  %v337_v34 = vld [vmem:[%s1571_s18 + $0x8] sm:$0xff]  ;;  %v1209_v35 = vcombine.low %v336_v33, %v336_v33  ;;  %v1210_v36 = vcombine.high %v336_v33, %v336_v33 }
  0x36   : > { %v1423_v27 = vld [vmem:[%s1576_s22 + $0x30] sm:$0xff]   ;;  %v1427_v31 = vld [vmem:[%s1576_s22 + $0x38] sm:$0xff]   ;;  %v1211_v37 = vcombine.low %v337_v34, %v337_v34  ;;  %v1212_v38 = vcombine.high %v337_v34, %v337_v34  ;;  %v335_v47 = vld [vmem:[#allocation2] sm:$0xff] }
  0x37   : > { %1269 = vmatpush3.bf16.msra.mxu0 %v1407_v11  ;;  %v1424_v28 = vld [vmem:[%s1576_s22 + $0xb0] sm:$0xff]   ;;  %v1428_v32 = vld [vmem:[%s1576_s22 + $0xb8] sm:$0xff]   ;;  %640 = vmatprep.mubr.bf16.mxu0 %v1210_v36  ;;  %v1433_v52 = vld [vmem:[%s1709_s5] sm:$0xff] (!%p1245_p3)  }
  0x38   : > { %1291 = vmatpush3.bf16.msra.mxu1 %v1408_v12  ;;  %1270 = vmatprep.subr.bf16.mxu0 %v1409_v13  ;;  %v1434_v54 = vld [vmem:[%s1709_s5 + $0x8] sm:$0xff] (!%p1245_p3)   ;;  %v699_v57 = vld [vmem:[%s1706_s2] sm:$0xf] (!%p1245_p3)  ;;  %v1437_v60 = vld [vmem:[%s1710_s6 + $0x10] sm:$0xff] (!%p1245_p3)  }
  0x39   : > { %1292 = vmatprep.subr.bf16.mxu1 %v1410_v14  ;;  %680 = vmatprep.mubr.bf16.mxu1 %v1212_v38  ;;  %v1435_v58 = vld [vmem:[%s1710_s6] sm:$0xff] (!%p1245_p3)   ;;  %v1436_v59 = vld [vmem:[%s1710_s6 + $0x8] sm:$0xff] (!%p1245_p3)   ;;  %v1438_v61 = vld [vmem:[%s1710_s6 + $0x18] sm:$0xff] (!%p1245_p3)  }
  0x3a   : > { %v1439_v62 = vld [vmem:[%s1710_s6 + $0x20] sm:$0xff] (!%p1245_p3)   ;;  %v1440_v63 = vld [vmem:[%s1710_s6 + $0x28] sm:$0xff] (!%p1245_p3)   ;;  %v1441_v0 = vld [vmem:[%s1710_s6 + $0x30] sm:$0xff] (!%p1245_p3)  }
  0x3b   : > { %1271 = vmatpush3.bf16.msra.mxu0 %v1411_v15  ;;  %v1442_v8 = vld [vmem:[%s1710_s6 + $0x38] sm:$0xff] (!%p1245_p3)  }
  0x3c   : > { %1293 = vmatpush3.bf16.msra.mxu1 %v1412_v16  ;;  %1272 = vmatprep.subr.bf16.mxu0 %v1413_v17  ;;  %v1253_v17 = vld [vmem:[%s1711_s7] ss:$0 sm:$0xff] (!%p1245_p3) }
  0x3d   : > { %1294 = vmatprep.subr.bf16.mxu1 %v1414_v18 }
  0x3f   : > { %1273 = vmatpush3.bf16.msra.mxu0 %v1415_v19 }
  0x40   : > { %1295 = vmatpush3.bf16.msra.mxu1 %v1416_v20  ;;  %1274 = vmatprep.subr.bf16.mxu0 %v1417_v21 }
  0x41   : > { %1296 = vmatprep.subr.bf16.mxu1 %v1418_v22 }
  0x43   : > { %1275 = vmatpush3.bf16.msra.mxu0 %v1419_v23 }
  0x44   : > { %1297 = vmatpush3.bf16.msra.mxu1 %v1420_v24  ;;  %1276 = vmatprep.subr.bf16.mxu0 %v1421_v25 }
  0x45   : > { %1298 = vmatprep.subr.bf16.mxu1 %v1422_v26 }
  0x47   : > { %1277 = vmatpush3.bf16.msra.mxu0 %v1423_v27 }
  0x48   : > { %1299 = vmatpush3.bf16.msra.mxu1 %v1424_v28  ;;  %1278 = vmatprep.subr.bf16.mxu0 %v1425_v29 }
  0x49   : > { %1300 = vmatprep.subr.bf16.mxu1 %v1426_v30 }
  0x4b   : > { %1279 = vmatpush3.bf16.msra.mxu0 %v1427_v31 }
  0x4c   : > { %1301 = vmatpush3.bf16.msra.mxu1 %v1428_v32  ;;  %1339 = vmatprep.subr.bf16.mxu0 (!%p1245_p3), %v1488_v53 }
  0x4d   : > { %1324 = vmatprep.subr.bf16.mxu1 (!%p1245_p3), %v1488_v53 }
  0x4e   : > { %641 = vmatmul.mubr.bf16.vlgmr.msra.gmra.mrb[0].mxu0 %v1209_v35 }
  0x4f   : > { %681 = vmatmul.mubr.bf16.vlgmr.msra.gmra.mrb[0].mxu1 %v1211_v37  ;;  %1355 = vmatprep.mubr.msk.bf16.mxu0 (!%p1245_p3), %vm1489_vm0, %v1488_v53 }
  0x50   : > { %1325 = vmatpush3.bf16.msra.mxu1 (!%p1245_p3), %v1433_v52  ;;  %1328 = vmatprep.mubr.msk.bf16.mxu1 (!%p1245_p3), %vm1489_vm0, %v1488_v53 }
  0x51   : > { %1326 = vmatprep.subr.bf16.mxu1 (!%p1245_p3), %v1488_v53  ;;  %1340 = vmatpush3.bf16.msra.mxu0 (!%p1245_p3), %v1435_v58 }
  0x52   : > { %1341 = vmatprep.subr.bf16.mxu0 (!%p1245_p3), %v1488_v53 }
  0x54   : > { %1327 = vmatpush3.bf16.msra.mxu1 (!%p1245_p3), %v1434_v54 }
  0x55   : > { %1342 = vmatpush3.bf16.msra.mxu0 (!%p1245_p3), %v1436_v59 }
  0x56   : > { %1343 = vmatprep.subr.bf16.mxu0 (!%p1245_p3), %v1488_v53 }
  0x59   : > { %1344 = vmatpush3.bf16.msra.mxu0 (!%p1245_p3), %v1437_v60 }
  0x5a   : > { %1345 = vmatprep.subr.bf16.mxu0 (!%p1245_p3), %v1488_v53 }
  0x5d   : > { %1346 = vmatpush3.bf16.msra.mxu0 (!%p1245_p3), %v1438_v61 }
  0x5e   : > { %1347 = vmatprep.subr.bf16.mxu0 (!%p1245_p3), %v1488_v53 }
  0x61   : > { %1348 = vmatpush3.bf16.msra.mxu0 (!%p1245_p3), %v1439_v62 }
  0x62   : > { %1349 = vmatprep.subr.bf16.mxu0 (!%p1245_p3), %v1488_v53 }
  0x65   : > { %1350 = vmatpush3.bf16.msra.mxu0 (!%p1245_p3), %v1440_v63 }
  0x66   : > { %1351 = vmatprep.subr.bf16.mxu0 (!%p1245_p3), %v1488_v53 }
  0x69   : > { %1352 = vmatpush3.bf16.msra.mxu0 (!%p1245_p3), %v1441_v0 }
  0x6a   : > { %1353 = vmatprep.subr.bf16.mxu0 (!%p1245_p3), %v1488_v53 }
  0x6d   : > { %1354 = vmatpush3.bf16.msra.mxu0 (!%p1245_p3), %v1442_v8 }
 0x121   : > { %v1280_v39 = vpop.f32.mrb[0].mxu0 }
 0x122   : > { %v1302_v40 = vpop.f32.mrb[0].mxu1  ;;  %v1281_v41 = vpop.f32.mrb[1].mxu0 }
 0x123   : > { %v1303_v42 = vpop.f32.mrb[1].mxu1  ;;  %v1282_v43 = vadd.f32 %v1281_v41, %v1280_v39  ;;  %v1283_v45 = vpop.f32.mrb[2].mxu0 }
 0x124   : > { %v1304_v44 = vadd.f32 %v1303_v42, %v1302_v40  ;;  %v1305_v46 = vpop.f32.mrb[2].mxu1  ;;  %v1284_v48 = vpop.f32.mrb[3].mxu0  ;;  %693 = sbr.rel (%p1245_p3) target bundleno = 1551 (0x60f), region = 64 }
 0x125   : > { %v1306_v49 = vpop.f32.mrb[3].mxu1  ;;  %1329 = vmatmul.mubr.msk.bf16.vlgmr.msra.gmra.mrb[0].mxu1 (!%p1245_p3), %vm716_vm1, %v699_v57 }
 0x126   : > { %v683_v50 = vadd.f32 %v1304_v44, %v1282_v43 }
 0x128   : > { %v688_v51 = vadd.f32 %v683_v50, %v335_v47  ;;  %v847_v47 = vlaneseq (!%p1245_p3) }
 0x12a   : > { %689 = vst [vmem:[#allocation2] sm:$0xff] %v688_v51  ;;  %v848_v48 = vshrl.u32 (!%p1245_p3), %v847_v47, 7  ;;  %v1673_v49 = vand.u32 (!%p1245_p3), 127, %v847_v47 }
 0x12c   : > { %vm851_vm4 = vcmp.eq.s32.totalorder %v848_v48, %v1673_v49  ;;  %vm1130_vm7 = vcmp.eq.s32.totalorder %v1673_v49, 0  ;;  %vm1133_vm8 = vcmp.eq.s32.totalorder %v1673_v49, 1  ;;  %vm1136_vm9 = vcmp.eq.s32.totalorder %v1673_v49, 2 }
 0x12d   : > { %v1252_v54 = vsel %vm851_vm4, 1.0, %v1488_v53  ;;  %vm1139_vm10 = vcmp.eq.s32.totalorder %v1673_v49, 3  ;;  %vm1142_vm11 = vcmp.eq.s32.totalorder %v1673_v49, 4 }
 0x131   : > { %v698_v55 = vld [vmem:[#allocation2] sm:$0xff] }
 0x132   : > { %v760_v56 = vmul.f32 %v698_v55, %v698_v55  ;;  %v946_v10 = vpack.c.bf16 %v698_v55, %v698_v55 }
 0x134   : > { %761 = vadd.xlane.f32.xlu0 %v760_v56  ;;  %1356 = vmatmul.mubr.bf16.vlgmr.msra.gmra.mrb[0].mxu0 %v946_v10 }
 0x1c1   : > { %v762_v1 = vpop.xlane.xlu0 %761 }
 0x1c2   : > { %v763_v6 = vadd.f32 1e-08, %v762_v1 }
 0x1c4   : > { %1443 = vrsqrt.f32 %v763_v6 }
 0x1ce   : > { %v1444_v9 = vpop.eup %1443 }
 0x1cf   : > { %v765_v11 = vmul.f32 %v1444_v9, %v698_v55 }
 0x1d1   : > { %1336 = vmatprep.mubr.f32.mxu1 %v765_v11 }
 0x1f8   : > { %v754_v2 = vpop.f32.mrb[0].mxu1 }
 0x1f9   : > { %v1330_v3 = vpop.f32.mrb[1].mxu1  ;;  %v766_v4 = vmul.f32 %v754_v2, %v754_v2 }
 0x1fa   : > { %v757_v5 = vpop.f32.mrb[2].mxu1 }
 0x1fb   : > { %v1331_v7 = vpop.f32.mrb[3].mxu1  ;;  %767 = vadd.xlane.f32.xlu0 %v766_v4  ;;  %v1058_v4 = vld [vmem:[%s1707_s3] sm:$0xff] }
 0x207   : > { %v1052_v18 = vpop.f32.mrb[0].mxu0 }
 0x208   : > { %v1663_v19 = vadd.f32 %v1253_v17, %v1052_v18  ;;  %v1357_v20 = vpop.f32.mrb[1].mxu0 }
 0x209   : > { %v1055_v21 = vpop.f32.mrb[2].mxu0 }
 0x20a   : > { %v1059_v22 = vsel %vm866_vm2, %v1663_v19, -inf  ;;  %v1358_v23 = vpop.f32.mrb[3].mxu0  ;;  %v1071_v6 = vmul.f32 %v1058_v4, %v1663_v19 }
 0x20b   : > { %1060 = vmax.xlane.f32.xlu0 %v1059_v22 }
 0x20c   : > { %v1072_v7 = vsel %vm866_vm2, %v1071_v6, 0.0 }
 0x288   : > { %v768_v12 = vpop.xlane.xlu0 %767 }
 0x289   : > { %v769_v13 = vadd.f32 1e-08, %v768_v12 }
 0x28b   : > { %1445 = vrsqrt.f32 %v769_v13 }
 0x295   : > { %v1446_v14 = vpop.eup %1445 }
 0x296   : > { %v771_v15 = vmul.f32 %v1446_v14, %v754_v2 }
 0x298   : > { %v1359_v16 = vpack.c.bf16 %v771_v15, %v765_v11  ;;  %v1061_v1 = vpop.xlane.xlu0 %1060 }
 0x299   : > { %v1062_v2 = vsub.f32 %v1663_v19, %v1061_v1 }
 0x29a   : > { %1360 = vmatprep.subr.bf16.mxu1 %v1359_v16 }
 0x29b   : > { %1362 = vmatpush3.bf16.xpose.msra.mxu1 %v1359_v16  ;;  %v1063_v53 = vmul.f32 1.442695, %v1062_v2 }
 0x2a2   : > { %1337 = vmatmul.mubr.f32.vlgmr.msra.gmra.mrb[4].mxu1 %v771_v15 }
 0x375   : > { %v1338_v24 = vpop.f32.mrb[4].mxu1 }
 0x376   : > { %v1667_v25 = vpop.f32.mrb[5].mxu1 }
 0x377   : > { %v854_v26 = vmul.f32 14.285714, %v1667_v25  ;;  %v1089_v15 = vsub.f32 %v1667_v25, %v1252_v54 }
 0x379   : > { %v856_v27 = vsel %vm855_vm3, %v854_v26, -inf  ;;  %v1090_v18 = vmul.f32 %v1089_v15, %v1089_v15 }
 0x37a   : > { %857 = vmax.xlane.f32.xlu1 %v856_v27  ;;  %v896_v28 = vrot.slane %v856_v27, 4 }
 0x37b   : > { %v1091_v21 = vsel %vm866_vm2, %v1090_v18, 0.0 }
 0x37c   : > { %v897_v29 = vmax.f32 %v856_v27, %v896_v28 }
 0x37e   : > { %v898_v30 = vrot.slane %v897_v29, 2 }
 0x380   : > { %v899_v31 = vmax.f32 %v897_v29, %v898_v30 }
 0x382   : > { %v900_v32 = vrot.slane %v899_v31, 1 }
 0x384   : > { %v901_v33 = vmax.f32 %v899_v31, %v900_v32 }
 0x386   : > { %v902_v34 = vsub.f32 %v854_v26, %v901_v33 }
 0x388   : > { %v903_v35 = vmul.f32 1.442695, %v902_v34 }
 0x38a   : > { %1447 = vpow2.f32 %v903_v35 }
 0x38b   : > { %874 = vrot.lane.b32.xlu1 %v854_v26, %s1490_s26 }
 0x394   : > { %v1448_v36 = vpop.eup %1447 }
 0x395   : > { %v905_v37 = vsel %vm855_vm3, %v1448_v36, 0.0 }
 0x396   : > { %v906_v38 = vrot.slane %v905_v37, 4 }
 0x398   : > { %v907_v39 = vadd.f32 %v906_v38, %v905_v37 }
 0x39a   : > { %v908_v40 = vrot.slane %v907_v39, 2 }
 0x39c   : > { %v909_v41 = vadd.f32 %v908_v40, %v907_v39 }
 0x39e   : > { %v910_v42 = vrot.slane %v909_v41, 1 }
 0x3a0   : > { %v911_v43 = vadd.f32 %v910_v42, %v909_v41 }
 0x3a2   : > { %1449 = vlog2.f32 %v911_v43 }
 0x3ac   : > { %v1450_v44 = vpop.eup %1449 }
 0x3ad   : > { %v913_v45 = vmul.f32 0.6931472, %v1450_v44 }
 0x3af   : > { %v914_v46 = vadd.f32 %v913_v45, %v901_v33 }
 0x407   : > { %v858_v50 = vpop.xlane.xlu1 %857 }
 0x408   : > { %v859_v51 = vsub.f32 %v854_v26, %v858_v50 }
 0x40a   : > { %v860_v52 = vmul.f32 1.442695, %v859_v51 }
 0x40b   : > { %v875_v55 = vpop.permute.xlu1 %874 }
 0x40c   : > { %1451 = vpow2.f32 %v860_v52  ;;  %v877_v56 = vmul.f32 %v1252_v54, %v875_v55 }
 0x40d   : > { %1453 = vpow2.f32 %v1063_v53 }
 0x40e   : > { %v878_v57 = vsel %vm866_vm2, %v877_v56, 0.0 }
 0x40f   : > { %v915_v58 = vrot.slane %v878_v57, 4 }
 0x411   : > { %v916_v59 = vadd.f32 %v915_v58, %v878_v57 }
 0x413   : > { %v917_v60 = vrot.slane %v916_v59, 2 }
 0x415   : > { %v918_v61 = vadd.f32 %v917_v60, %v916_v59 }
 0x416   : > { %v1452_v62 = vpop.eup %1451 }
 0x417   : > { %863 = vrot.lane.b32.xlu0 %v1452_v62, %s1490_s26  ;;  %v919_v63 = vrot.slane %v918_v61, 1  ;;  %v1454_v3 = vpop.eup %1453 }
 0x418   : > { %v1065_v5 = vsel %vm866_vm2, %v1454_v3, 0.0 }
 0x419   : > { %v920_v0 = vadd.f32 %v919_v63, %v918_v61 }
 0x41b   : > { %922 = vrot.lane.b32.xlu1 %v920_v0, %s1491_s28 }
 0x436   : > { %1066 = vadd.xlane.f32.xlu0 %v1065_v5 }
 0x43a   : > { %1073 = vadd.xlane.f32.xlu0 %v1072_v7 }
 0x43f   : > { %879 = vadd.xlane.f32.xlu1 %v878_v57 }
 0x450   : > { %1105 = vrot.lane.b32.xlu0 %v1338_v24, %s1490_s26 }
 0x489   : > { %v864_v8 = vpop.permute.xlu0 %863 }
 0x48a   : > { %v867_v9 = vsel %vm866_vm2, %v864_v8, 0.0 }
 0x48b   : > { %868 = vadd.xlane.f32.xlu1 %v867_v9 }
 0x48d   : > { %v923_v10 = vpop.permute.xlu1 %922 }
 0x48e   : > { %v925_v11 = vsub.f32 %v914_v46, %v923_v10 }
 0x49c   : > { %927 = vrot.lane.b32.xlu1 %v925_v11, %s1490_s26 }
 0x4c3   : > { %v1067_v12 = vpop.xlane.xlu0 %1066 }
 0x4c4   : > { %1455 = vlog2.f32 %v1067_v12 }
 0x4c7   : > { %v1074_v20 = vpop.xlane.xlu0 %1073 }
 0x4cb   : > { %v1106_v28 = vpop.permute.xlu0 %1105 }
 0x4cc   : > { %v880_v13 = vpop.xlane.xlu1 %879  ;;  %v1108_v31 = vsub.f32 %v1667_v25, %v1106_v28 }
 0x4ce   : > { %v1456_v19 = vpop.eup %1455  ;;  %v1109_v33 = vmul.f32 %v1108_v31, %v1108_v31 }
 0x4cf   : > { %v1069_v22 = vmul.f32 0.6931472, %v1456_v19 }
 0x4d0   : > { %v1110_v35 = vsel %vm866_vm2, %v1109_v33, 0.0 }
 0x4d1   : > { %v1070_v26 = vadd.f32 %v1069_v22, %v1061_v1 }
 0x4d3   : > { %v1075_v30 = vsub.f32 %v1070_v26, %v1074_v20 }
 0x4d5   : > { %v1076_v34 = vsel %vm882_vm6, %v1075_v30, 0.0 }
 0x518   : > { %v869_v14 = vpop.xlane.xlu1 %868 }
 0x519   : > { %1457 = vlog2.f32 %v869_v14 }
 0x51c   : > { %v928_v16 = vpop.permute.xlu1 %927 }
 0x51d   : > { %v931_v17 = vsel %vm930_vm5, %v928_v16, 0.0 }
 0x51e   : > { %932 = vadd.xlane.f32.xlu0 %v931_v17 }
 0x522   : > { %1092 = vadd.xlane.f32.xlu0 %v1091_v21 }
 0x523   : > { %v1458_v23 = vpop.eup %1457 }
 0x524   : > { %v871_v24 = vmul.f32 0.6931472, %v1458_v23 }
 0x526   : > { %v872_v27 = vadd.f32 %v871_v24, %v858_v50 }
 0x528   : > { %v881_v29 = vsub.f32 %v872_v27, %v880_v13 }
 0x52a   : > { %v883_v32 = vsel %vm882_vm6, %v881_v29, 0.0 }
 0x52b   : > { %884 = vadd.xlane.f32.xlu1 %v883_v32 }
 0x52f   : > { %1077 = vadd.xlane.f32.xlu1 %v1076_v34 }
 0x533   : > { %1111 = vadd.xlane.f32.xlu1 %v1110_v35 }
 0x5ab   : > { %v933_v36 = vpop.xlane.xlu0 %932 }
 0x5ac   : > { %v934_v37 = vrot.slane %v933_v36, 4 }
 0x5ae   : > { %v935_v39 = vadd.f32 %v934_v37, %v933_v36 }
 0x5af   : > { %v1093_v38 = vpop.xlane.xlu0 %1092 }
 0x5b0   : > { %v1094_v40 = vrot.slane %v1093_v38, 4  ;;  %v936_v41 = vrot.slane %v935_v39, 2 }
 0x5b2   : > { %v1095_v42 = vadd.f32 %v1094_v40, %v1093_v38  ;;  %v937_v47 = vadd.f32 %v936_v41, %v935_v39 }
 0x5b4   : > { %v1096_v46 = vrot.slane %v1095_v42, 2  ;;  %v938_v56 = vrot.slane %v937_v47, 1 }
 0x5b6   : > { %v1097_v54 = vadd.f32 %v1096_v46, %v1095_v42  ;;  %v939_v63 = vadd.f32 %v938_v56, %v937_v47 }
 0x5b8   : > { %v885_v43 = vpop.xlane.xlu1 %884  ;;  %v1098_v0 = vrot.slane %v1097_v54, 1 }
 0x5b9   : > { %v886_v44 = vrot.slane %v885_v43, 4 }
 0x5ba   : > { %v1099_v4 = vadd.f32 %v1098_v0, %v1097_v54 }
 0x5bb   : > { %v887_v45 = vadd.f32 %v886_v44, %v885_v43 }
 0x5bc   : > { %v1078_v25 = vpop.xlane.xlu1 %1077 }
 0x5bd   : > { %v888_v48 = vrot.slane %v887_v45, 2  ;;  %v1079_v50 = vrot.slane %v1078_v25, 4 }
 0x5bf   : > { %v1080_v51 = vadd.f32 %v1079_v50, %v1078_v25  ;;  %v889_v52 = vadd.f32 %v888_v48, %v887_v45 }
 0x5c0   : > { %v1112_v55 = vpop.xlane.xlu1 %1111 }
 0x5c1   : > { %v1081_v57 = vrot.slane %v1080_v51, 2  ;;  %v1113_v58 = vrot.slane %v1112_v55, 4  ;;  %v890_v59 = vrot.slane %v889_v52, 1 }
 0x5c3   : > { %v1114_v60 = vadd.f32 %v1113_v58, %v1112_v55  ;;  %v891_v61 = vadd.f32 %v890_v59, %v889_v52  ;;  %v1082_v62 = vadd.f32 %v1081_v57, %v1080_v51 }
 0x5c5   : > { %v1115_v1 = vrot.slane %v1114_v60, 2  ;;  %1363 = vpush %v891_v61  ;;  %v1083_v2 = vrot.slane %v1082_v62, 1 }
 0x5c6   : > { %1365 = vpush %v939_v63 }
 0x5c7   : > { %v1116_v53 = vadd.f32 %v1115_v1, %v1114_v60  ;;  %v1084_v3 = vadd.f32 %v1083_v2, %v1082_v62 }
 0x5c9   : > { %1367 = vpush %v1084_v3  ;;  %v1117_v5 = vrot.slane %v1116_v53, 1 }
 0x5ca   : > { %1369 = vpush %v1099_v4 }
 0x5cb   : > { %v1118_v6 = vadd.f32 %v1117_v5, %v1116_v53 }
 0x5cd   : > { %1371 = vpush %v1118_v6 }
 0x5f6   : > { %s1364_s9 = spop %1363 }
 0x5f7   : > { %s895_s11 = smul.f32 0.125, %s1364_s9  ;;  %s1366_s12 = spop %1365 }
 0x5f8   : > { %s943_s13 = smul.f32 0.125, %s1366_s12 }
 0x5fa   : > { %s944_s16 = sadd.f32 %s943_s13, %s895_s11  ;;  %s1368_s17 = spop %1367 }
 0x5fb   : > { %s1370_s19 = spop %1369  ;;  %s1088_s21 = smul.f32 0.125, %s1368_s17 }
 0x5fc   : > { %s945_s18 = smul.f32 0.5, %s944_s16 }
 0x5fd   : > { %s1103_s24 = smul.f32 0.015625, %s1370_s19  ;;  %v1137_v10 = vstv %s1088_s21 }
 0x5fe   : > { %s1123_s22 = smul.f32 %s945_s18, %s694_s10  ;;  %s1372_s23 = spop %1371  ;;  %v1134_v8 = vstv %s945_s18 }
 0x5ff   : > { %s1122_s25 = smul.f32 0.015625, %s1372_s23  ;;  %v1140_v12 = vstv %s1103_s24 }
 0x600   : > { %s1124_s26 = smul.f32 %s1247_s14, %s1103_s24 }
 0x601   : > { %s1126_s28 = smul.f32 %s1248_s15, %s1122_s25  ;;  %v1143_v15 = vstv %s1122_s25 }
 0x602   : > { %s1125_s29 = sadd.f32 %s1124_s26, %s1123_s22  ;;  %s1128_s30 = smul.f32 %s1246_s20, %s1088_s21 }
 0x604   : > { %s1127_s0 = sadd.f32 %s1126_s28, %s1125_s29 }
 0x606   : > { %s1129_s9 = sadd.f32 %s1128_s30, %s1127_s0 }
 0x608   : > { %v1131_v7 = vstv %s1129_s9 }
 0x609   : > { %v1132_v9 = vsel %vm1130_vm7, %v1131_v7, 0.0 }
 0x60a   : > { %v1135_v11 = vsel %vm1133_vm8, %v1134_v8, %v1132_v9 }
 0x60b   : > { %v1138_v13 = vsel %vm1136_vm9, %v1137_v10, %v1135_v11 }
 0x60c   : > { %v1141_v14 = vsel %vm1139_vm10, %v1140_v12, %v1138_v13 }
 0x60d   : > { %v1144_v16 = vsel %vm1142_vm11, %v1143_v15, %v1141_v14 }
 0x60e   : > { %1145 = vst [vmem:[%s1712_s8] sm:$0x1] %v1144_v16 }
 0x60f PF: > { %s19_s27 = sadd.s32 1, %s1484_s27  }
 0x610   : > { %p16_p4 = scmp.ge.s32.totalorder %s19_s27, 4  }
 0x612   :  { %18 = sbr.rel (!%p16_p4) target bundleno = 3 (0x3), region = 94 }
 0x619   :  { %1157 = vsyncpa [#allocation4], 1 }
 0x61a   :  { %1159 = vsyncpa [#allocation4 + $0x1], 1 }

</bundles_post_ra>
